<compile_context>
chip_gen: v7x
topology: tpu7x:2x2x1
jax: 0.10.0
libtpu: 0.0.40
codegen_flags: <defaults>
</compile_context>

<pallas_src>
import math
from functools import partial

import jax
import jax.numpy as jnp
from jax import lax
from jax.experimental import pallas as pl
from jax.experimental.pallas import tpu as pltpu


_VMEM_LIMIT = 32 * 1024 * 1024      # explicit scoped-VMEM limit, safe on v5e/v6e/v7x
_MXU_DTYPE = jnp.bfloat16           # MXU-native inputs for the attn @ V matmul


def _pick_tile(n, candidates=(512, 256, 128)):
    """Largest candidate tile that divides n, else the full extent."""
    for c in candidates:
        if n % c == 0:
            return c
    return n


# ------------------------------------------------------------------ linear ---

def _linear_kernel(x_ref, w_ref, b_ref, o_ref):
    # y = x @ W + b  (W already stored (in, out); no transpose at call time)
    o_ref[...] = (
        jnp.dot(x_ref[...], w_ref[...], preferred_element_type=jnp.float32)
        + b_ref[...]
    ).astype(o_ref.dtype)


def pallas_linear(x2d, w, b):
    M, d_in = x2d.shape
    d_out = w.shape[1]
    tm = _pick_tile(M)
    return pl.pallas_call(
        _linear_kernel,
        out_shape=jax.ShapeDtypeStruct((M, d_out), jnp.float32),
        grid=(M // tm,),
        in_specs=[
            pl.BlockSpec((tm, d_in), lambda i: (i, 0)),
            pl.BlockSpec((d_in, d_out), lambda i: (0, 0)),
            pl.BlockSpec((1, d_out), lambda i: (0, 0)),
        ],
        out_specs=pl.BlockSpec((tm, d_out), lambda i: (i, 0)),
        compiler_params=pltpu.CompilerParams(
            dimension_semantics=("parallel",),
            vmem_limit_bytes=_VMEM_LIMIT),
    )(x2d, w, b.reshape(1, d_out))


# ---------------------------------------------------------------- FFN fuse ---

def _ffn_kernel(x_ref, w1_ref, b1_ref, w2_ref, b2_ref, o_ref):
    h = jnp.dot(x_ref[...], w1_ref[...], preferred_element_type=jnp.float32) + b1_ref[...]
    h = jnp.maximum(h, 0.0)                      # ReLU
    o_ref[...] = (
        jnp.dot(h, w2_ref[...], preferred_element_type=jnp.float32) + b2_ref[...]
    ).astype(o_ref.dtype)


def pallas_ffn(x2d, w1, b1, w2, b2):
    M, d_in = x2d.shape
    d_ff = w1.shape[1]
    d_out = w2.shape[1]
    tm = _pick_tile(M)
    return pl.pallas_call(
        _ffn_kernel,
        out_shape=jax.ShapeDtypeStruct((M, d_out), jnp.float32),
        grid=(M // tm,),
        in_specs=[
            pl.BlockSpec((tm, d_in), lambda i: (i, 0)),
            pl.BlockSpec((d_in, d_ff), lambda i: (0, 0)),
            pl.BlockSpec((1, d_ff), lambda i: (0, 0)),
            pl.BlockSpec((d_ff, d_out), lambda i: (0, 0)),
            pl.BlockSpec((1, d_out), lambda i: (0, 0)),
        ],
        out_specs=pl.BlockSpec((tm, d_out), lambda i: (i, 0)),
        compiler_params=pltpu.CompilerParams(
            dimension_semantics=("parallel",),
            vmem_limit_bytes=_VMEM_LIMIT),
    )(x2d, w1, b1.reshape(1, d_ff), w2, b2.reshape(1, d_out))


# ------------------------------------------------------ residual + LayerNorm --

def _add_ln_kernel(x_ref, r_ref, g_ref, b_ref, o_ref, *, eps):
    s = x_ref[...] + r_ref[...]
    mu = jnp.mean(s, axis=-1, keepdims=True)
    c = s - mu
    var = jnp.mean(c * c, axis=-1, keepdims=True)
    o_ref[...] = (c * lax.rsqrt(var + eps) * g_ref[...] + b_ref[...]).astype(o_ref.dtype)


def pallas_add_layernorm(x2d, res2d, gain, bias, eps=1e-5):
    M, D = x2d.shape
    tm = _pick_tile(M)
    return pl.pallas_call(
        partial(_add_ln_kernel, eps=eps),
        out_shape=jax.ShapeDtypeStruct((M, D), jnp.float32),
        grid=(M // tm,),
        in_specs=[
            pl.BlockSpec((tm, D), lambda i: (i, 0)),
            pl.BlockSpec((tm, D), lambda i: (i, 0)),
            pl.BlockSpec((1, D), lambda i: (0, 0)),
            pl.BlockSpec((1, D), lambda i: (0, 0)),
        ],
        out_specs=pl.BlockSpec((tm, D), lambda i: (i, 0)),
        compiler_params=pltpu.CompilerParams(
            dimension_semantics=("parallel",),
            vmem_limit_bytes=_VMEM_LIMIT),
    )(x2d, res2d, gain.reshape(1, D), bias.reshape(1, D))


# --------------------------------------------------------------- attention ---

def _attention_kernel(gamma_ref, q_ref, k_ref, v_ref, o_ref, *,
                      scale, n_heads, d_k, mask_k, zero_pad):
    qi = pl.program_id(1)                 # query-block index
    tq = q_ref.shape[1]
    L = k_ref.shape[1]
    neg = jnp.float32(-1e32)

    # Causal mask + position effect built in-kernel (no (L,L) mask DMA).
    # src_mask[i, j] = 1  <=>  j < i + mask_k   (mask_k=1 incl. diag, 0 strict)
    row = lax.broadcasted_iota(jnp.int32, (tq, L), 0) + qi * tq   # global query idx
    col = lax.broadcasted_iota(jnp.int32, (tq, L), 1)             # key idx
    keep = col < row + mask_k
    pos_effect = jnp.abs((col - row).astype(jnp.float32))
    zero_row = row == 0                                           # zero_pad rows

    # (disttotal - distcum)[i, j] = sum_{k > j} s_[i, k]  ==  s_ @ tri
    # with tri[k, j] = 1 iff k > j  (single f32 matmul, no lane-wise cumsum).
    tri = (lax.broadcasted_iota(jnp.int32, (L, L), 0)
           > lax.broadcasted_iota(jnp.int32, (L, L), 1)).astype(jnp.float32)

    head_outs = []
    for h in range(n_heads):
        lo = h * d_k
        qh = q_ref[0, :, pl.ds(lo, d_k)]        # (tq, d_k)
        kh = k_ref[0, :, pl.ds(lo, d_k)]        # (L,  d_k)
        vh = v_ref[0, :, pl.ds(lo, d_k)]        # (L,  d_k)

        # scores = q @ k^T / sqrt(d_k); f32 accumulation, contraction on dim 1
        # of both operands (no materialised k^T).  Kept f32: it feeds two exp's.
        scores = jnp.einsum(
            "qd,kd->qk", qh, kh,
            preferred_element_type=jnp.float32) * scale           # (tq, L)

        # ---- distance-decay term (the no-grad branch of the PyTorch code) ---
        masked = jnp.where(keep, scores, neg)
        m1 = jnp.max(masked, axis=-1, keepdims=True)
        e1 = jnp.exp(masked - m1)
        s_ = e1 * pl.reciprocal(jnp.sum(e1, axis=-1, keepdims=True), approx=True)
        s_ = jnp.where(keep, s_, 0.0)
        remaining = jnp.dot(s_, tri, preferred_element_type=jnp.float32)
        dist_scores = jnp.sqrt(jnp.maximum(remaining * pos_effect, 0.0))

        g = gamma_ref[h]                        # -softplus(gamma_h), from SMEM
        total_effect = jnp.clip(jnp.exp(dist_scores * g), 1e-5, 1e5)

        # ---- decayed, masked softmax ---------------------------------------
        dscores = jnp.where(keep, scores * total_effect, neg)
        m2 = jnp.max(dscores, axis=-1, keepdims=True)
        e2 = jnp.exp(dscores - m2)
        attn = e2 * pl.reciprocal(jnp.sum(e2, axis=-1, keepdims=True), approx=True)
        if zero_pad:
            attn = jnp.where(zero_row, 0.0, attn)   # zero out global query row 0
        # TODO(synk): dropout on attention weights treated as identity (eval mode).

        out_h = jnp.dot(attn.astype(_MXU_DTYPE), vh.astype(_MXU_DTYPE),
                        preferred_element_type=jnp.float32)       # (tq, d_k)
        head_outs.append(out_h)

    # Single lane-dense store of the whole (tq, d_model) output tile.
    o_ref[0, :, :] = jnp.concatenate(head_outs, axis=-1).astype(o_ref.dtype)


def pallas_attention(q3, k3, v3, neg_softplus_gamma, n_heads, d_k, mask_k, zero_pad):
    bs, L, D = q3.shape
    tq = _pick_tile(L, candidates=(256, 128))   # query tiling caps live (tq, L) tiles
    kernel = partial(_attention_kernel, scale=1.0 / math.sqrt(d_k),
                     n_heads=n_heads, d_k=d_k, mask_k=mask_k, zero_pad=zero_pad)
    return pl.pallas_call(
        kernel,
        out_shape=jax.ShapeDtypeStruct((bs, L, D), jnp.float32),
        grid=(bs, L // tq),
        in_specs=[
            pl.BlockSpec(memory_space=pltpu.MemorySpace.SMEM),   # -softplus(gammas), (h,)
            pl.BlockSpec((1, tq, D), lambda b, i: (b, i, 0)),    # q rows tile
            pl.BlockSpec((1, L, D), lambda b, i: (b, 0, 0)),     # full K
            pl.BlockSpec((1, L, D), lambda b, i: (b, 0, 0)),     # full V
        ],
        out_specs=pl.BlockSpec((1, tq, D), lambda b, i: (b, i, 0)),
        compiler_params=pltpu.CompilerParams(
            dimension_semantics=("parallel", "parallel"),
            vmem_limit_bytes=_VMEM_LIMIT),
    )(neg_softplus_gamma, q3, k3, v3)


# ---------------------------------------------------------- module wrappers --

def multi_head_attention_forward(params, query, key, values, n_heads, d_k,
                                 mask_k, zero_pad, kq_same=True):
    bs, L, D = query.shape
    key2 = key.reshape(bs * L, D)

    # Fused K/V projection when key-input == value-input: x is read once and a
    # single (D, 2D) matmul is far friendlier to the MXU than two (D, D) ones.
    if values is key:
        w_kv = jnp.concatenate([params["k_w"], params["v_w"]], axis=1)
        b_kv = jnp.concatenate([params["k_b"], params["v_b"]], axis=0)
        kv = pallas_linear(key2, w_kv, b_kv)
        k_p, v_p = kv[:, :D], kv[:, D:]
    else:
        k_p = pallas_linear(key2, params["k_w"], params["k_b"])
        v_p = pallas_linear(values.reshape(bs * L, D), params["v_w"], params["v_b"])

    if kq_same:
        q_p = k_p if (query is key) else pallas_linear(
            query.reshape(bs * L, D), params["k_w"], params["k_b"])
    else:
        q_p = pallas_linear(query.reshape(bs * L, D), params["q_w"], params["q_b"])

    # gamma = -softplus(gammas) hoisted out of the kernel (per-head scalar table).
    neg_softplus_gamma = -jax.nn.softplus(params["gammas"])

    ctx = pallas_attention(q_p.reshape(bs, L, D), k_p.reshape(bs, L, D),
                           v_p.reshape(bs, L, D), neg_softplus_gamma,
                           n_heads, d_k, mask_k, zero_pad)

    out = pallas_linear(ctx.reshape(bs * L, D), params["out_w"], params["out_b"])
    return out.reshape(bs, L, D)


def transformer_layer_forward(lp, mask_int, query, key, values, *,
                              n_heads, d_k, kq_same, apply_pos=True):
    bs, L, D = query.shape
    zero_pad = (mask_int == 0)
    attn_out = multi_head_attention_forward(lp["mha"], query, key, values,
                                            n_heads, d_k, mask_int, zero_pad, kq_same)
    # residual + LayerNorm1 (dropout1 == identity in eval mode)
    x = pallas_add_layernorm(attn_out.reshape(bs * L, D), query.reshape(bs * L, D),
                             lp["ln1_g"], lp["ln1_b"])
    if apply_pos:
        ffn = pallas_ffn(x, lp["w1"], lp["b1"], lp["w2"], lp["b2"])
        x = pallas_add_layernorm(ffn, x, lp["ln2_g"], lp["ln2_b"])
    return x.reshape(bs, L, D)


def architecture_forward(params, q_embed_data, qa_embed_data, *, n_heads, d_k, kq_same):
    y = qa_embed_data
    x = q_embed_data
    for lp in params["blocks_1"]:
        y = transformer_layer_forward(lp, 1, y, y, y,
                                      n_heads=n_heads, d_k=d_k, kq_same=kq_same)
    flag_first = True
    for lp in params["blocks_2"]:
        if flag_first:
            flag_first = False
        else:
            x = transformer_layer_forward(lp, 0, x, x, y,
                                          n_heads=n_heads, d_k=d_k, kq_same=kq_same)
            flag_first = True
    return x


# ------------------------------------------------------------------ params ---

def _xavier_uniform(key, shape, fan_in, fan_out):
    bound = math.sqrt(6.0 / (fan_in + fan_out))
    return jax.random.uniform(key, shape, jnp.float32, -bound, bound)


def init_mha_params(key, d_model, n_heads, kq_same):
    ks = jax.random.split(key, 5)
    p = {
        # weights stored (in, out) once, so no transpose at call time
        "k_w": _xavier_uniform(ks[0], (d_model, d_model), d_model, d_model),
        "k_b": jnp.zeros((d_model,), jnp.float32),
        "v_w": _xavier_uniform(ks[1], (d_model, d_model), d_model, d_model),
        "v_b": jnp.zeros((d_model,), jnp.float32),
        "out_w": _xavier_uniform(ks[2], (d_model, d_model), d_model, d_model),
        "out_b": jnp.zeros((d_model,), jnp.float32),
        # nn.Parameter(zeros(h,1,1)) + xavier_uniform_  ->  flat (h,)
        "gammas": _xavier_uniform(ks[3], (n_heads,), 1, n_heads),
    }
    if not kq_same:
        p["q_w"] = _xavier_uniform(ks[4], (d_model, d_model), d_model, d_model)
        p["q_b"] = jnp.zeros((d_model,), jnp.float32)
    return p


def init_layer_params(key, d_model, d_ff, n_heads, kq_same):
    k_mha, k1, k2 = jax.random.split(key, 3)

    def default_linear(k, fan_in, fan_out):
        kw, kb = jax.random.split(k)
        bound = 1.0 / math.sqrt(fan_in)
        w = jax.random.uniform(kw, (fan_in, fan_out), jnp.float32, -bound, bound)
        b = jax.random.uniform(kb, (fan_out,), jnp.float32, -bound, bound)
        return w, b

    w1, b1 = default_linear(k1, d_model, d_ff)
    w2, b2 = default_linear(k2, d_ff, d_model)
    return {
        "mha": init_mha_params(k_mha, d_model, n_heads, kq_same),
        "w1": w1, "b1": b1, "w2": w2, "b2": b2,
        "ln1_g": jnp.ones((d_model,), jnp.float32),
        "ln1_b": jnp.zeros((d_model,), jnp.float32),
        "ln2_g": jnp.ones((d_model,), jnp.float32),
        "ln2_b": jnp.zeros((d_model,), jnp.float32),
    }


def init_architecture_params(key, n_blocks, d_model, d_ff, n_heads, kq_same):
    keys = jax.random.split(key, 3 * n_blocks)
    return {
        "blocks_1": [init_layer_params(keys[i], d_model, d_ff, n_heads, kq_same)
                     for i in range(n_blocks)],
        "blocks_2": [init_layer_params(keys[n_blocks + i], d_model, d_ff, n_heads, kq_same)
                     for i in range(2 * n_blocks)],
    }


# ------------------------------------------------ pure-JAX reference check ---

def _ref_layernorm(x, g, b, eps=1e-5):
    mu = jnp.mean(x, axis=-1, keepdims=True)
    var = jnp.mean((x - mu) ** 2, axis=-1, keepdims=True)
    return (x - mu) / jnp.sqrt(var + eps) * g + b


def ref_mha(params, query, key, values, n_heads, d_k, mask_k, zero_pad, kq_same=True):
    bs, L, D = query.shape
    k_p = key @ params["k_w"] + params["k_b"]
    if kq_same:
        q_p = query @ params["k_w"] + params["k_b"]
    else:
        q_p = query @ params["q_w"] + params["q_b"]
    v_p = values @ params["v_w"] + params["v_b"]

    def split(x):
        return x.reshape(bs, L, n_heads, d_k).transpose(0, 2, 1, 3)

    qh, kh, vh = split(q_p), split(k_p), split(v_p)
    mask = (jnp.triu(jnp.ones((L, L), jnp.float32), k=mask_k) == 0
            ).astype(jnp.float32)[None, None]
    scores = jnp.einsum("bhld,bhmd->bhlm", qh, kh) / math.sqrt(d_k)
    scores_ = jnp.where(mask == 0, -1e32, scores)
    scores_ = jax.nn.softmax(scores_, axis=-1) * mask
    distcum = jnp.cumsum(scores_, axis=-1)
    disttotal = jnp.sum(scores_, axis=-1, keepdims=True)
    pos = jnp.abs(jnp.arange(L)[None, :] - jnp.arange(L)[:, None]
                  ).astype(jnp.float32)[None, None]
    dist = jnp.sqrt(jnp.clip((disttotal - distcum) * pos, 0.0, None))
    gamma = -jax.nn.softplus(params["gammas"]).reshape(1, n_heads, 1, 1)
    total_effect = jnp.clip(jnp.exp(dist * gamma), 1e-5, 1e5)
    scores = jnp.where(mask == 0, -1e32, scores * total_effect)
    attn = jax.nn.softmax(scores, axis=-1)
    if zero_pad:
        attn = attn.at[:, :, 0, :].set(0.0)
    ctx = jnp.einsum("bhlm,bhmd->bhld", attn, vh)
    concat = ctx.transpose(0, 2, 1, 3).reshape(bs, L, D)
    return concat @ params["out_w"] + params["out_b"]


def ref_transformer_layer(lp, mask_k, query, key, values, *, n_heads, d_k,
                          kq_same, apply_pos=True):
    zero_pad = (mask_k == 0)
    a = ref_mha(lp["mha"], query, key, values, n_heads, d_k, mask_k, zero_pad, kq_same)
    x = _ref_layernorm(query + a, lp["ln1_g"], lp["ln1_b"])
    if apply_pos:
        h = jnp.maximum(x @ lp["w1"] + lp["b1"], 0.0)
        f = h @ lp["w2"] + lp["b2"]
        x = _ref_layernorm(x + f, lp["ln2_g"], lp["ln2_b"])
    return x


def ref_architecture(params, q_embed_data, qa_embed_data, *, n_heads, d_k, kq_same):
    y = qa_embed_data
    x = q_embed_data
    for lp in params["blocks_1"]:
        y = ref_transformer_layer(lp, 1, y, y, y,
                                  n_heads=n_heads, d_k=d_k, kq_same=kq_same)
    flag_first = True
    for lp in params["blocks_2"]:
        if flag_first:
            flag_first = False
        else:
            x = ref_transformer_layer(lp, 0, x, x, y,
                                      n_heads=n_heads, d_k=d_k, kq_same=kq_same)
            flag_first = True
    return x


# -------------------------------------------------------------------- main ---

if __name__ == "__main__":
    key = jax.random.PRNGKey(0)
    bs, L = 2, 8
    d_model, n_heads, d_ff, n_blocks = 32, 4, 64, 1
    kq_same = True
    d_k = d_model // n_heads

    pkey, k1, k2 = jax.random.split(key, 3)
    params = init_architecture_params(pkey, n_blocks, d_model, d_ff, n_heads, kq_same)
    q_embed = jax.random.normal(k1, (bs, L, d_model), jnp.float32)
    qa_embed = jax.random.normal(k2, (bs, L, d_model), jnp.float32)

    # --- single attention-layer check (strict mask + zero_pad path) ----------
    mha_params = params["blocks_2"][1]["mha"]
    mha_out = multi_head_attention_forward(mha_params, q_embed, q_embed, qa_embed,
                                           n_heads, d_k, mask_k=0, zero_pad=True,
                                           kq_same=kq_same)
    mha_out = jax.block_until_ready(mha_out)
    mha_ref = ref_mha(mha_params, q_embed, q_embed, qa_embed, n_heads, d_k,
                      mask_k=0, zero_pad=True, kq_same=kq_same)
    if not jnp.allclose(mha_out, mha_ref, rtol=5e-2, atol=5e-2):
        err = float(jnp.max(jnp.abs(mha_out - mha_ref)))
        raise AssertionError(f"MHA mismatch vs reference (max abs err {err:.3e})")

    # --- full Architecture forward -------------------------------------------
    out = architecture_forward(params, q_embed, qa_embed,
                               n_heads=n_heads, d_k=d_k, kq_same=kq_same)
    out = jax.block_until_ready(out)
    assert out.shape == (bs, L, d_model)

    ref = ref_architecture(params, q_embed, qa_embed,
                           n_heads=n_heads, d_k=d_k, kq_same=kq_same)
    # bf16 attn@V inputs + approx reciprocal are intentional numerics changes,
    # so the end-to-end tolerance is loose (logic bugs give O(1) errors).
    if not jnp.allclose(out, ref, rtol=1e-1, atol=1.5e-1):
        err = float(jnp.max(jnp.abs(out - ref)))
        raise AssertionError(f"Architecture mismatch vs reference (max abs err {err:.3e})")

    print("KERNEL_OK")
</pallas_src>

<mosaic_0001>
module attributes {stable_mosaic.version = 11 : i64} {
  func.func @_linear_kernel(%arg0: i32, %arg1: memref<16x32xf32, #tpu.memory_space<vmem>>, %arg2: memref<32x32xf32, #tpu.memory_space<vmem>>, %arg3: memref<1x32xf32, #tpu.memory_space<vmem>>, %arg4: memref<16x32xf32, #tpu.memory_space<vmem>>) attributes {dimension_semantics = [#tpu.dimension_semantics<parallel>], iteration_bounds = array<i64: 1>, scalar_prefetch = 0 : i64, scratch_operands = 0 : i64, tpu.core_type = #tpu.core_type<tc>, window_params = [{transform_indices = @transform_0, window_bounds = array<i64: 16, 32>}, {pipeline_mode = #tpu.pipeline_mode<synchronous>, transform_indices = @transform_1, window_bounds = array<i64: 32, 32>}, {pipeline_mode = #tpu.pipeline_mode<synchronous>, transform_indices = @transform_2, window_bounds = array<i64: 1, 32>}, {transform_indices = @transform_3, window_bounds = array<i64: 16, 32>}]} {
    %c0 = arith.constant 0 : index
    %c0_0 = arith.constant 0 : index
    %0 = vector.load %arg1[%c0, %c0_0] : memref<16x32xf32, #tpu.memory_space<vmem>>, vector<16x32xf32>
    %c0_1 = arith.constant 0 : index
    %c0_2 = arith.constant 0 : index
    %1 = vector.load %arg2[%c0_1, %c0_2] : memref<32x32xf32, #tpu.memory_space<vmem>>, vector<32x32xf32>
    %cst = arith.constant dense<0.000000e+00> : vector<16x32xf32>
    %2 = tpu.matmul %0, %1, %cst {dimension_numbers = #tpu.dot_dimension_numbers<[1], [0], [0], [1], [0, 0, 1, 1], [], []>} : vector<16x32xf32>, vector<32x32xf32>, vector<16x32xf32> -> vector<16x32xf32>
    %c0_3 = arith.constant 0 : index
    %c0_4 = arith.constant 0 : index
    %3 = vector.load %arg3[%c0_3, %c0_4] : memref<1x32xf32, #tpu.memory_space<vmem>>, vector<1x32xf32>
    %4 = vector.broadcast %3 : vector<1x32xf32> to vector<16x32xf32>
    %5 = arith.addf %2, %4 : vector<16x32xf32>
    %c0_5 = arith.constant 0 : index
    %c0_6 = arith.constant 0 : index
    %6 = vector.load %arg4[%c0_5, %c0_6] : memref<16x32xf32, #tpu.memory_space<vmem>>, vector<16x32xf32>
    tpu.vector_store %arg4[%c0_5, %c0_6], %5 {strides = array<i32>} : memref<16x32xf32, #tpu.memory_space<vmem>>, vector<16x32xf32>,
    return
  }
  func.func @transform_0(%arg0: i32) -> (i32, i32) {
    %c0_i32 = arith.constant 0 : i32
    %c0_i32_0 = arith.constant 0 : i32
    return %arg0, %c0_i32 : i32, i32
  }
  func.func @transform_1(%arg0: i32) -> (i32, i32) {
    %c0_i32 = arith.constant 0 : i32
    %c0_i32_0 = arith.constant 0 : i32
    %c0_i32_1 = arith.constant 0 : i32
    return %c0_i32, %c0_i32_0 : i32, i32
  }
  func.func @transform_2(%arg0: i32) -> (i32, i32) {
    %c0_i32 = arith.constant 0 : i32
    %c0_i32_0 = arith.constant 0 : i32
    %c0_i32_1 = arith.constant 0 : i32
    return %c0_i32, %c0_i32_0 : i32, i32
  }
  func.func @transform_3(%arg0: i32) -> (i32, i32) {
    %c0_i32 = arith.constant 0 : i32
    %c0_i32_0 = arith.constant 0 : i32
    return %arg0, %c0_i32 : i32, i32
  }
}

</mosaic_0001>

<bundles_post_ra>
// kernel: tpu_custom_call.1
= control target key start
LH: loop header
LB: loop body
LE: loop exit
PB: predicated region body
PF: predicated region fallthrough
CT: control target
= control target key end

     0   :  { %8 = vsyncpa [#allocation3], 0  ;;  %s340_s0 = inlined_call_operand.hbm [shape: f32[16,32], index: 0, kind: input, shape index: {}]   ;;  %s341_s1 = inlined_call_operand.hbm [shape: f32[32,32], index: 1, kind: input, shape index: {}]   ;;  %s342_s2 = inlined_call_operand.vmem [shape: f32[1,32], index: 2, kind: input, shape index: {}]   ;;  %s343_s3 = inlined_call_operand.hbm [shape: f32[16,32], index: 3, kind: output, shape index: {}]  }
   0x1   :  { %9 = vsyncpa [#allocation6], 0 }
   0x2   :  { %10 = vsyncpa [#allocation4], 0  ;;  %s263_s12 = smov [#allocation2]   ;;  %s191_s16 = scalar_lea.hbm %s340_s0, 256 }
   0x3   :  { %s16_s13 = sshll.u32 %s263_s12, 4  ;;  %p192_p0 = scmp.ne.s32.totalorder %s340_s0, %s191_s16  ;;  %s17_s13 = int_to_ptr.vmem [resolvable:$true] %s16_s13 }
   0x4   :  { %p195_p1 = scmp.lt.u32.totalorder %s191_s16, %s340_s0 }
   0x6   :  { %p197_p2 = pnand %p195_p1, %p192_p0 }
   0x8   :  { %200 = shalt.err (!%p197_p2)
}
   0x9   :  { %s201_s21 = scalar_lea.vmem %s17_s13, 256  ;;  %p206_p4 = scmp.lt.s32.totalorder %s17_s13, %s17_s13 }
   0xa   :  { %p202_p3 = scmp.ne.s32.totalorder %s17_s13, %s201_s21  ;;  %p207_p5 = scmp.lt.s32.totalorder %s201_s21, %s201_s21 }
   0xc   :  { %p208_p6 = por %p207_p5, %p206_p4 }
   0xe   :  { %p209_p7 = pnand %p208_p6, %p202_p3 }
  0x10   :  { %212 = shalt.err (!%p209_p7)
}
  0x11   :  { %s264_s22 = smov 128   ;;  %s265_s23 = smov 8  }
  0x12   :  { %22 = dma.hbm_to_vmem [thread:$0]  %s340_s0, 256, %s17_s13, [#allocation3], %s264_s22, %s264_s22, %s265_s23  }
  0x13   :  { %s266_s26 = smov [#allocation5]   ;;  %s213_s30 = scalar_lea.hbm %s341_s1, 512 }
  0x14   :  { %s28_s27 = sshll.u32 %s266_s26, 4  ;;  %p214_p8 = scmp.ne.s32.totalorder %s341_s1, %s213_s30  ;;  %s29_s27 = int_to_ptr.vmem [resolvable:$true] %s28_s27 }
  0x15   :  { %p217_p9 = scmp.lt.u32.totalorder %s213_s30, %s341_s1 }
  0x17   :  { %p219_p10 = pnand %p217_p9, %p214_p8 }
  0x19   :  { %222 = shalt.err (!%p219_p10)
}
  0x1a   :  { %s223_s8 = scalar_lea.vmem %s29_s27, 512  ;;  %p228_p12 = scmp.lt.s32.totalorder %s29_s27, %s29_s27 }
  0x1b   :  { %p224_p11 = scmp.ne.s32.totalorder %s29_s27, %s223_s8  ;;  %p229_p13 = scmp.lt.s32.totalorder %s223_s8, %s223_s8 }
  0x1d   :  { %p230_p0 = por %p229_p13, %p228_p12 }
  0x1f   :  { %p231_p1 = pnand %p230_p0, %p224_p11 }
  0x21   :  { %234 = shalt.err (!%p231_p1)
}
  0x22   :  { %34 = dma.hbm_to_vmem [thread:$0]  %s341_s1, 512, %s29_s27, [#allocation6], %s264_s22, %s264_s22, %s265_s23  }
  0x23   :  { %257 = dma.done.wait [#allocation3], 256  }
  0x24   :  { %258 = vsyncadd [#allocation3], 4294967040 }
  0x25   :  { %259 = dma.done.wait [#allocation6], 512  }
  0x26   :  { %260 = vsyncadd [#allocation6], 4294966784  ;;  %vm56_vm0 = vcmask 261120   ;;  %v45_v0 = vld [vmem:[#allocation5] sm:$0xff]  ;;  %v46_v1 = vld [vmem:[#allocation5 + $0x8] sm:$0xff]  ;;  %s267_s11 = smov [#allocation7]  }
  0x27   :  { %v47_v2 = vld [vmem:[#allocation5 + $0x10] sm:$0xff]  ;;  %v178_v3 = vpack.c.bf16 %v46_v1, %v45_v0  ;;  %v48_v4 = vld [vmem:[#allocation5 + $0x18] sm:$0xff]  ;;  %s145_s12 = sshll.u32 %s267_s11, 4  ;;  %s146_s12 = int_to_ptr.vmem [resolvable:$true] %s145_s12 }
  0x28   :  { %v43_v5 = vld [vmem:[#allocation2] sm:$0xff]  ;;  %v182_v6 = vpack.c.bf16 %v48_v4, %v47_v2  ;;  %v44_v7 = vld [vmem:[#allocation2 + $0x8] sm:$0xff]  ;;  %s235_s13 = scalar_lea.vmem %s146_s12, 256  ;;  %p240_p3 = scmp.lt.s32.totalorder %s146_s12, %s146_s12 }
  0x29   :  { %175 = vmatprep.mubr.msk.f32.mxu0 %vm56_vm0, %v43_v5  ;;  %179 = vmatprep.subr.bf16.mxu0 %v178_v3  ;;  %v158_v8 = vld [vmem:[%s342_s2] ss:$0 sm:$0xff]  ;;  %p236_p2 = scmp.ne.s32.totalorder %s146_s12, %s235_s13  ;;  %p241_p4 = scmp.lt.s32.totalorder %s235_s13, %s235_s13 }
  0x2a   :  { %181 = vmatpush3.bf16.msra.mxu0 %v178_v3 }
  0x2b   :  { %183 = vmatprep.subr.bf16.mxu0 %v182_v6  ;;  %p242_p5 = por %p241_p4, %p240_p3 }
  0x2d   :  { %p243_p6 = pnand %p242_p5, %p236_p2 }
  0x2e   :  { %185 = vmatpush3.bf16.msra.mxu0 %v182_v6 }
  0x31   :  { %176 = vmatmul.mubr.msk.f32.vlgmr.msra.gmra.mrb[0].mxu0 %vm56_vm0, %v44_v7 }
 0x104   :  { %v177_v9 = vpop.f32.mrb[0].mxu0 }
 0x105   :  { %v135_v10 = vadd.f32 %v177_v9, %v158_v8  ;;  %v129_v11 = vpop.f32.mrb[1].mxu0 }
 0x106   :  { %v130_v12 = vadd.f32 %v158_v8, %v129_v11 }
 0x107   :  { %139 = vst.msk [vmem:[#allocation7 + $0x8] sm:$0xff] %vm56_vm0, %v135_v10 }
 0x108   :  { %138 = vst.msk [vmem:[#allocation7] sm:$0xff] %vm56_vm0, %v130_v12 }
 0x109   :  { %246 = shalt.err (!%p243_p6)
}
 0x10a   :  { %s247_s15 = scalar_lea.hbm %s343_s3, 256 }
 0x10b   :  { %p248_p7 = scmp.ne.s32.totalorder %s343_s3, %s247_s15  ;;  %p251_p8 = scmp.lt.u32.totalorder %s247_s15, %s343_s3 }
 0x10d   :  { %p253_p9 = pnand %p251_p8, %p248_p7 }
 0x10f   :  { %256 = shalt.err (!%p253_p9)
}
 0x110   :  { %151 = dma.vmem_to_hbm [thread:$0]  %s146_s12, 256, %s343_s3, [#allocation4], %s264_s22, %s264_s22, %s265_s23  }
 0x111   :  { %261 = dma.done.wait [#allocation4], 256  }
 0x112   :  { %262 = vsyncadd [#allocation4], 4294967040 }
 0x113   :  { %155 = vsyncpa [#allocation3], 1 }
 0x114   :  { %156 = vsyncpa [#allocation6], 1 }
 0x115   :  { %157 = vsyncpa [#allocation4], 1 }

</bundles_post_ra>
